<compile_context>
chip_gen: v7x
topology: tpu7x:2x2x1
jax: 0.10.0
libtpu: 0.0.40
codegen_flags: <defaults>
</compile_context>

<pallas_src>
import jax
import jax.numpy as jnp
from jax.experimental import pallas as pl
from jax.experimental.pallas import tpu as pltpu

HID1, HID2, HID3 = 128, 64, 32
OBS_PAD = 8          # observation dim padded to one sublane group
ACT_PAD = 128        # action dim padded to a full lane group (lane-dense store)
_PAD_BIAS = -1e4     # bias for padded action columns -> exp underflows to exactly 0
_ROW_ALIGN = 16      # bf16 sublane-pair alignment for batch tiles
_MAX_TILE_B = 8192   # VMEM safety cap for the batch tile


def _mlp_kernel(x_ref,
                w1_ref, b1_ref,
                w2_ref, b2_ref,
                w3_ref, b3_ref,
                w4_ref, b4_ref,
                o_ref):
    # x: [TILE_B, OBS_PAD] bf16; weights bf16 [in, out]; biases f32 [1, out].

    def _sigmoid_bf16(h):
        # sigmoid(h) == 0.5*tanh(0.5*h) + 0.5  -> one EUP transcendental per
        # element (vs exp + add + reciprocal), VPU mul/add are free slots.
        return (0.5 * jnp.tanh(0.5 * h) + 0.5).astype(jnp.bfloat16)

    h = _sigmoid_bf16(jnp.dot(x_ref[...], w1_ref[...],
                              preferred_element_type=jnp.float32) + b1_ref[...])
    h = _sigmoid_bf16(jnp.dot(h, w2_ref[...],
                              preferred_element_type=jnp.float32) + b2_ref[...])
    h = _sigmoid_bf16(jnp.dot(h, w3_ref[...],
                              preferred_element_type=jnp.float32) + b3_ref[...])
    logits = jnp.dot(h, w4_ref[...],
                     preferred_element_type=jnp.float32) + b4_ref[...]

    # Max-free softmax: real logits are bounded to a few units (sigmoid inputs
    # in [0,1], |w4|,|b4| <= 1/sqrt(32)), so exp cannot overflow in f32.
    # Padded action columns have a -1e4 bias -> exp == 0 exactly, so the row
    # softmax runs over the real actions only. A row-wise softmax equals
    # PyTorch Softmax(dim=0) applied to each 1-D observation's output.
    e = jnp.exp(logits)
    denom = jnp.sum(e, axis=-1, keepdims=True)
    o_ref[...] = (e * pl.reciprocal(denom, approx=True)).astype(o_ref.dtype)


def _round_up(x, m):
    return (x + m - 1) // m * m


def _choose_tile_b(batch_rows, tile_b):
    """Batch-tile heuristic: multiple of 16, capped for VMEM, and never a
    single grid step for a large batch (so v7x's 2 TensorCores both work)."""
    b_min = _round_up(max(int(batch_rows), 1), _ROW_ALIGN)
    tile_b = _round_up(max(int(tile_b), _ROW_ALIGN), _ROW_ALIGN)
    tile_b = min(tile_b, _MAX_TILE_B)
    if tile_b >= b_min:
        if b_min >= 2 * _ROW_ALIGN:
            # Split the batch into (at least) 2 steps instead of 1.
            tile_b = _round_up((b_min + 1) // 2, _ROW_ALIGN)
        else:
            tile_b = b_min
    return tile_b


def init_params(key, obs_size, action_size):
    """PyTorch nn.Linear-style init: U[-1/sqrt(fan_in), +1/sqrt(fan_in)].
    Weights stored as [in, out] (transposed vs. torch), biases as [1, out]."""
    dims = [(obs_size, HID1), (HID1, HID2), (HID2, HID3), (HID3, action_size)]
    params = []
    for fan_in, fan_out in dims:
        key, kw, kb = jax.random.split(key, 3)
        bound = 1.0 / jnp.sqrt(jnp.float32(fan_in))
        w = jax.random.uniform(kw, (fan_in, fan_out), jnp.float32, -bound, bound)
        b = jax.random.uniform(kb, (1, fan_out), jnp.float32, -bound, bound)
        params.append((w, b))
    return params


def prepare_params(params, obs_size, action_size):
    """Pad + cast weights for the kernel: bf16 weights, f32 biases.
    obs dim zero-padded to OBS_PAD; action dim padded to ACT_PAD with a
    -1e4 bias so padded logits vanish under (max-free) softmax."""
    (w1, b1), (w2, b2), (w3, b3), (w4, b4) = params
    w1p = jnp.zeros((OBS_PAD, HID1), jnp.bfloat16).at[:obs_size, :].set(
        w1.astype(jnp.bfloat16))
    w4p = jnp.zeros((HID3, ACT_PAD), jnp.bfloat16).at[:, :action_size].set(
        w4.astype(jnp.bfloat16))
    b4p = jnp.full((1, ACT_PAD), _PAD_BIAS, jnp.float32).at[:, :action_size].set(
        b4.astype(jnp.float32))
    return (w1p, b1.astype(jnp.float32),
            w2.astype(jnp.bfloat16), b2.astype(jnp.float32),
            w3.astype(jnp.bfloat16), b3.astype(jnp.float32),
            w4p, b4p)


def pad_observations(x, obs_size, tile_b):
    """[B, obs_size] f32 -> [round_up(B, tile_b), OBS_PAD] bf16 padded buffer.
    ES loops should build/keep observations directly in this layout so the
    kernel input needs no extra HBM pad pass per call."""
    B = x.shape[0]
    b_pad = _round_up(B, tile_b)
    xp = jnp.zeros((b_pad, OBS_PAD), jnp.bfloat16)
    return xp.at[:B, :obs_size].set(x.astype(jnp.bfloat16))


def net_forward_padded(xp, packed, *, tile_b):
    """Core entry point (recommended for the ES loop).

    xp: [b_pad, OBS_PAD] bf16 with b_pad % tile_b == 0 (see pad_observations).
    Returns the padded [b_pad, ACT_PAD] bf16 probability block UNSLICED; the
    first `action_size` columns of the first B rows are the real softmax
    probabilities (slice lazily at the consumer).
    """
    b_pad, obs_pad = xp.shape
    assert obs_pad == OBS_PAD and b_pad % tile_b == 0, (xp.shape, tile_b)
    grid = (b_pad // tile_b,)

    w1p, b1, w2, b2, w3, b3, w4p, b4p = packed

    def const(shape):  # weights/biases: constant block index -> VMEM-resident
        return pl.BlockSpec(shape, lambda i: (0, 0))

    # Raise the scoped-VMEM limit only for very large tiles; 48 MiB leaves
    # headroom under v7x's 64 MiB physical VMEM (v5e/v6e have 128 MiB).
    vmem_limit = 48 * 1024 * 1024 if tile_b >= 4096 else None

    return pl.pallas_call(
        _mlp_kernel,
        out_shape=jax.ShapeDtypeStruct((b_pad, ACT_PAD), jnp.bfloat16),
        grid=grid,
        in_specs=[
            pl.BlockSpec((tile_b, OBS_PAD), lambda i: (i, 0)),   # x tile
            const((OBS_PAD, HID1)), const((1, HID1)),
            const((HID1, HID2)),    const((1, HID2)),
            const((HID2, HID3)),    const((1, HID3)),
            const((HID3, ACT_PAD)), const((1, ACT_PAD)),
        ],
        out_specs=pl.BlockSpec((tile_b, ACT_PAD), lambda i: (i, 0)),
        compiler_params=pltpu.CompilerParams(
            dimension_semantics=("parallel",),
            vmem_limit_bytes=vmem_limit),
    )(xp, w1p, b1, w2, b2, w3, b3, w4p, b4p)


def net_forward_batched(x, packed, obs_size, action_size, tile_b=2048):
    """Drop-in convenience wrapper: [B, obs_size] f32 -> [B, action_size] f32
    softmax probabilities. Pads the input and slices the output on the host
    side (two extra HBM passes); performance-critical ES loops should use
    pad_observations + net_forward_padded and slice lazily instead."""
    B = x.shape[0]
    tile_b = _choose_tile_b(B, tile_b)
    xp = pad_observations(x, obs_size, tile_b)
    out = net_forward_padded(xp, packed, tile_b=tile_b)
    return out[:B, :action_size].astype(jnp.float32)


def net_forward(x, packed, obs_size, action_size):
    """Single 1-D observation: exactly the original PyTorch module semantics
    (Softmax(dim=0) over the action logits)."""
    return net_forward_batched(x[None, :], packed, obs_size, action_size,
                               tile_b=_ROW_ALIGN)[0]


def _reference_f32(x, params):
    """Pure-f32 reference matching the PyTorch module, row by row."""
    h = x
    for i, (w, b) in enumerate(params):
        h = h @ w + b
        if i < 3:
            h = jax.nn.sigmoid(h)
    return jax.nn.softmax(h, axis=-1)


def _reference_kernel_math(x, params):
    """Reference mimicking the kernel's bf16-in / f32-accumulate math."""
    h = x.astype(jnp.bfloat16)
    for i, (w, b) in enumerate(params):
        h = jnp.dot(h, w.astype(jnp.bfloat16),
                    preferred_element_type=jnp.float32) + b
        if i < 3:
            h = jax.nn.sigmoid(h).astype(jnp.bfloat16)
    return jax.nn.softmax(h, axis=-1)


if __name__ == "__main__":
    obs_size, action_size = 4, 2          # CartPole-v1
    key = jax.random.PRNGKey(0)
    key, kx, kx2 = jax.random.split(key, 3)

    params = init_params(key, obs_size, action_size)
    packed = prepare_params(params, obs_size, action_size)

    # --- small demo batch: tile_b=16 -> grid of 3 steps ---------------------
    B = 48
    xb = jax.random.normal(kx, (B, obs_size), jnp.float32)

    out = net_forward_batched(xb, packed, obs_size, action_size, tile_b=16)
    out = jax.block_until_ready(out)
    assert out.shape == (B, action_size)

    ref_bf16 = _reference_kernel_math(xb, params)   # same math as the kernel
    ref_f32 = _reference_f32(xb, params)            # original f32 module
    assert jnp.allclose(out, ref_bf16, atol=1e-2), \
        float(jnp.max(jnp.abs(out - ref_bf16)))
    assert jnp.allclose(out, ref_f32, atol=4e-2), \
        float(jnp.max(jnp.abs(out - ref_f32)))
    assert jnp.allclose(jnp.sum(out, axis=-1), 1.0, atol=2e-2)

    # --- recommended production path: pre-padded in, padded bf16 out -------
    tile_b = _choose_tile_b(B, 16)
    xp = pad_observations(xb, obs_size, tile_b)
    out_padded = jax.block_until_ready(
        net_forward_padded(xp, packed, tile_b=tile_b))
    assert out_padded.shape == (_round_up(B, tile_b), ACT_PAD)
    assert out_padded.dtype == jnp.bfloat16
    assert jnp.allclose(out_padded[:B, :action_size].astype(jnp.float32),
                        out, atol=1e-6)

    # --- medium batch exercising the large-tile path (2 steps of 2048) -----
    B2 = 4096
    xb2 = jax.random.normal(kx2, (B2, obs_size), jnp.float32)
    out2 = jax.block_until_ready(
        net_forward_batched(xb2, packed, obs_size, action_size))
    assert out2.shape == (B2, action_size)
    ref2 = _reference_kernel_math(xb2, params)
    assert jnp.allclose(out2, ref2, atol=1e-2), \
        float(jnp.max(jnp.abs(out2 - ref2)))
    assert jnp.allclose(jnp.sum(out2, axis=-1), 1.0, atol=2e-2)

    # --- single 1-D observation (Softmax(dim=0) over the action logits) ----
    out1 = jax.block_until_ready(
        net_forward(xb[0], packed, obs_size, action_size))
    assert out1.shape == (action_size,)
    assert jnp.allclose(out1, ref_bf16[0], atol=1e-2)

    print("KERNEL_OK")
</pallas_src>

<mosaic_0001>
module attributes {stable_mosaic.version = 11 : i64} {
  func.func @_mlp_kernel(%arg0: i32, %arg1: memref<16x8xbf16, #tpu.memory_space<vmem>>, %arg2: memref<8x128xbf16, #tpu.memory_space<vmem>>, %arg3: memref<1x128xf32, #tpu.memory_space<vmem>>, %arg4: memref<128x64xbf16, #tpu.memory_space<vmem>>, %arg5: memref<1x64xf32, #tpu.memory_space<vmem>>, %arg6: memref<64x32xbf16, #tpu.memory_space<vmem>>, %arg7: memref<1x32xf32, #tpu.memory_space<vmem>>, %arg8: memref<32x128xbf16, #tpu.memory_space<vmem>>, %arg9: memref<1x128xf32, #tpu.memory_space<vmem>>, %arg10: memref<16x128xbf16, #tpu.memory_space<vmem>>) attributes {dimension_semantics = [#tpu.dimension_semantics<parallel>], iteration_bounds = array<i64: 3>, scalar_prefetch = 0 : i64, scratch_operands = 0 : i64, tpu.core_type = #tpu.core_type<tc>, window_params = [{transform_indices = @transform_0, window_bounds = array<i64: 16, 8>}, {pipeline_mode = #tpu.pipeline_mode<synchronous>, transform_indices = @transform_1, window_bounds = array<i64: 8, 128>}, {pipeline_mode = #tpu.pipeline_mode<synchronous>, transform_indices = @transform_2, window_bounds = array<i64: 1, 128>}, {pipeline_mode = #tpu.pipeline_mode<synchronous>, transform_indices = @transform_3, window_bounds = array<i64: 128, 64>}, {pipeline_mode = #tpu.pipeline_mode<synchronous>, transform_indices = @transform_4, window_bounds = array<i64: 1, 64>}, {pipeline_mode = #tpu.pipeline_mode<synchronous>, transform_indices = @transform_5, window_bounds = array<i64: 64, 32>}, {pipeline_mode = #tpu.pipeline_mode<synchronous>, transform_indices = @transform_6, window_bounds = array<i64: 1, 32>}, {pipeline_mode = #tpu.pipeline_mode<synchronous>, transform_indices = @transform_7, window_bounds = array<i64: 32, 128>}, {pipeline_mode = #tpu.pipeline_mode<synchronous>, transform_indices = @transform_8, window_bounds = array<i64: 1, 128>}, {transform_indices = @transform_9, window_bounds = array<i64: 16, 128>}]} {
    %c0 = arith.constant 0 : index
    %c0_0 = arith.constant 0 : index
    %0 = vector.load %arg1[%c0, %c0_0] : memref<16x8xbf16, #tpu.memory_space<vmem>>, vector<16x8xbf16>
    %c0_1 = arith.constant 0 : index
    %c0_2 = arith.constant 0 : index
    %1 = vector.load %arg2[%c0_1, %c0_2] : memref<8x128xbf16, #tpu.memory_space<vmem>>, vector<8x128xbf16>
    %cst = arith.constant dense<0.000000e+00> : vector<16x128xf32>
    %2 = tpu.matmul %0, %1, %cst {dimension_numbers = #tpu.dot_dimension_numbers<[1], [0], [0], [1], [0, 0, 1, 1], [], []>} : vector<16x8xbf16>, vector<8x128xbf16>, vector<16x128xf32> -> vector<16x128xf32>
    %c0_3 = arith.constant 0 : index
    %c0_4 = arith.constant 0 : index
    %3 = vector.load %arg3[%c0_3, %c0_4] : memref<1x128xf32, #tpu.memory_space<vmem>>, vector<1x128xf32>
    %4 = vector.broadcast %3 : vector<1x128xf32> to vector<16x128xf32>
    %5 = arith.addf %2, %4 : vector<16x128xf32>
    %cst_5 = arith.constant 5.000000e-01 : f32
    %6 = vector.broadcast %cst_5 : f32 to vector<16x128xf32>
    %7 = arith.mulf %6, %5 : vector<16x128xf32>
    %8 = math.tanh %7 : vector<16x128xf32>
    %cst_6 = arith.constant 5.000000e-01 : f32
    %9 = vector.broadcast %cst_6 : f32 to vector<16x128xf32>
    %10 = arith.mulf %9, %8 : vector<16x128xf32>
    %cst_7 = arith.constant 5.000000e-01 : f32
    %11 = vector.broadcast %cst_7 : f32 to vector<16x128xf32>
    %12 = arith.addf %10, %11 : vector<16x128xf32>
    %13 = arith.truncf %12 : vector<16x128xf32> to vector<16x128xbf16>
    %c0_8 = arith.constant 0 : index
    %c0_9 = arith.constant 0 : index
    %14 = vector.load %arg4[%c0_8, %c0_9] : memref<128x64xbf16, #tpu.memory_space<vmem>>, vector<128x64xbf16>
    %cst_10 = arith.constant dense<0.000000e+00> : vector<16x64xf32>
    %15 = tpu.matmul %13, %14, %cst_10 {dimension_numbers = #tpu.dot_dimension_numbers<[1], [0], [0], [1], [0, 0, 1, 1], [], []>} : vector<16x128xbf16>, vector<128x64xbf16>, vector<16x64xf32> -> vector<16x64xf32>
    %c0_11 = arith.constant 0 : index
    %c0_12 = arith.constant 0 : index
    %16 = vector.load %arg5[%c0_11, %c0_12] : memref<1x64xf32, #tpu.memory_space<vmem>>, vector<1x64xf32>
    %17 = vector.broadcast %16 : vector<1x64xf32> to vector<16x64xf32>
    %18 = arith.addf %15, %17 : vector<16x64xf32>
    %cst_13 = arith.constant 5.000000e-01 : f32
    %19 = vector.broadcast %cst_13 : f32 to vector<16x64xf32>
    %20 = arith.mulf %19, %18 : vector<16x64xf32>
    %21 = math.tanh %20 : vector<16x64xf32>
    %cst_14 = arith.constant 5.000000e-01 : f32
    %22 = vector.broadcast %cst_14 : f32 to vector<16x64xf32>
    %23 = arith.mulf %22, %21 : vector<16x64xf32>
    %cst_15 = arith.constant 5.000000e-01 : f32
    %24 = vector.broadcast %cst_15 : f32 to vector<16x64xf32>
    %25 = arith.addf %23, %24 : vector<16x64xf32>
    %26 = arith.truncf %25 : vector<16x64xf32> to vector<16x64xbf16>
    %c0_16 = arith.constant 0 : index
    %c0_17 = arith.constant 0 : index
    %27 = vector.load %arg6[%c0_16, %c0_17] : memref<64x32xbf16, #tpu.memory_space<vmem>>, vector<64x32xbf16>
    %cst_18 = arith.constant dense<0.000000e+00> : vector<16x32xf32>
    %28 = tpu.matmul %26, %27, %cst_18 {dimension_numbers = #tpu.dot_dimension_numbers<[1], [0], [0], [1], [0, 0, 1, 1], [], []>} : vector<16x64xbf16>, vector<64x32xbf16>, vector<16x32xf32> -> vector<16x32xf32>
    %c0_19 = arith.constant 0 : index
    %c0_20 = arith.constant 0 : index
    %29 = vector.load %arg7[%c0_19, %c0_20] : memref<1x32xf32, #tpu.memory_space<vmem>>, vector<1x32xf32>
    %30 = vector.broadcast %29 : vector<1x32xf32> to vector<16x32xf32>
    %31 = arith.addf %28, %30 : vector<16x32xf32>
    %cst_21 = arith.constant 5.000000e-01 : f32
    %32 = vector.broadcast %cst_21 : f32 to vector<16x32xf32>
    %33 = arith.mulf %32, %31 : vector<16x32xf32>
    %34 = math.tanh %33 : vector<16x32xf32>
    %cst_22 = arith.constant 5.000000e-01 : f32
    %35 = vector.broadcast %cst_22 : f32 to vector<16x32xf32>
    %36 = arith.mulf %35, %34 : vector<16x32xf32>
    %cst_23 = arith.constant 5.000000e-01 : f32
    %37 = vector.broadcast %cst_23 : f32 to vector<16x32xf32>
    %38 = arith.addf %36, %37 : vector<16x32xf32>
    %39 = arith.truncf %38 : vector<16x32xf32> to vector<16x32xbf16>
    %c0_24 = arith.constant 0 : index
    %c0_25 = arith.constant 0 : index
    %40 = vector.load %arg8[%c0_24, %c0_25] : memref<32x128xbf16, #tpu.memory_space<vmem>>, vector<32x128xbf16>
    %cst_26 = arith.constant dense<0.000000e+00> : vector<16x128xf32>
    %41 = tpu.matmul %39, %40, %cst_26 {dimension_numbers = #tpu.dot_dimension_numbers<[1], [0], [0], [1], [0, 0, 1, 1], [], []>} : vector<16x32xbf16>, vector<32x128xbf16>, vector<16x128xf32> -> vector<16x128xf32>
    %c0_27 = arith.constant 0 : index
    %c0_28 = arith.constant 0 : index
    %42 = vector.load %arg9[%c0_27, %c0_28] : memref<1x128xf32, #tpu.memory_space<vmem>>, vector<1x128xf32>
    %43 = vector.broadcast %42 : vector<1x128xf32> to vector<16x128xf32>
    %44 = arith.addf %41, %43 : vector<16x128xf32>
    %45 = math.exp %44 : vector<16x128xf32>
    %cst_29 = arith.constant dense<0.000000e+00> : vector<16xf32>
    %46 = vector.multi_reduction <add>, %45, %cst_29 [1] : vector<16x128xf32> to vector<16xf32>
    %47 = vector.shape_cast %46 : vector<16xf32> to vector<16x1xf32>
    %48 = tpu.reciprocal %47 {approx = true} : vector<16x1xf32> -> vector<16x1xf32>
    %49 = vector.broadcast %48 : vector<16x1xf32> to vector<16x128xf32>
    %50 = arith.mulf %45, %49 : vector<16x128xf32>
    %51 = arith.truncf %50 : vector<16x128xf32> to vector<16x128xbf16>
    %c0_30 = arith.constant 0 : index
    %c0_31 = arith.constant 0 : index
    %52 = vector.load %arg10[%c0_30, %c0_31] : memref<16x128xbf16, #tpu.memory_space<vmem>>, vector<16x128xbf16>
    tpu.vector_store %arg10[%c0_30, %c0_31], %51 {strides = array<i32>} : memref<16x128xbf16, #tpu.memory_space<vmem>>, vector<16x128xbf16>,
    return
  }
  func.func @transform_0(%arg0: i32) -> (i32, i32) {
    %c0_i32 = arith.constant 0 : i32
    %c0_i32_0 = arith.constant 0 : i32
    return %arg0, %c0_i32 : i32, i32
  }
  func.func @transform_1(%arg0: i32) -> (i32, i32) {
    %c0_i32 = arith.constant 0 : i32
    %c0_i32_0 = arith.constant 0 : i32
    %c0_i32_1 = arith.constant 0 : i32
    return %c0_i32, %c0_i32_0 : i32, i32
  }
  func.func @transform_2(%arg0: i32) -> (i32, i32) {
    %c0_i32 = arith.constant 0 : i32
    %c0_i32_0 = arith.constant 0 : i32
    %c0_i32_1 = arith.constant 0 : i32
    return %c0_i32, %c0_i32_0 : i32, i32
  }
  func.func @transform_3(%arg0: i32) -> (i32, i32) {
    %c0_i32 = arith.constant 0 : i32
    %c0_i32_0 = arith.constant 0 : i32
    %c0_i32_1 = arith.constant 0 : i32
    return %c0_i32, %c0_i32_0 : i32, i32
  }
  func.func @transform_4(%arg0: i32) -> (i32, i32) {
    %c0_i32 = arith.constant 0 : i32
    %c0_i32_0 = arith.constant 0 : i32
    %c0_i32_1 = arith.constant 0 : i32
    return %c0_i32, %c0_i32_0 : i32, i32
  }
  func.func @transform_5(%arg0: i32) -> (i32, i32) {
    %c0_i32 = arith.constant 0 : i32
    %c0_i32_0 = arith.constant 0 : i32
    %c0_i32_1 = arith.constant 0 : i32
    return %c0_i32, %c0_i32_0 : i32, i32
  }
  func.func @transform_6(%arg0: i32) -> (i32, i32) {
    %c0_i32 = arith.constant 0 : i32
    %c0_i32_0 = arith.constant 0 : i32
    %c0_i32_1 = arith.constant 0 : i32
    return %c0_i32, %c0_i32_0 : i32, i32
  }
  func.func @transform_7(%arg0: i32) -> (i32, i32) {
    %c0_i32 = arith.constant 0 : i32
    %c0_i32_0 = arith.constant 0 : i32
    %c0_i32_1 = arith.constant 0 : i32
    return %c0_i32, %c0_i32_0 : i32, i32
  }
  func.func @transform_8(%arg0: i32) -> (i32, i32) {
    %c0_i32 = arith.constant 0 : i32
    %c0_i32_0 = arith.constant 0 : i32
    %c0_i32_1 = arith.constant 0 : i32
    return %c0_i32, %c0_i32_0 : i32, i32
  }
  func.func @transform_9(%arg0: i32) -> (i32, i32) {
    %c0_i32 = arith.constant 0 : i32
    %c0_i32_0 = arith.constant 0 : i32
    return %arg0, %c0_i32 : i32, i32
  }
}

</mosaic_0001>

<bundles_post_ra>
// kernel: tpu_custom_call.1
= control target key start
LH: loop header
LB: loop body
LE: loop exit
PB: predicated region body
PF: predicated region fallthrough
CT: control target
= control target key end

     0   :  { %14 = vsyncpa [#allocation3], 0  ;;  %s1276_s0 = inlined_call_operand.vmem [shape: bf16[48,8], index: 0, kind: input, shape index: {}]   ;;  %s1277_s1 = inlined_call_operand.vmem [shape: bf16[8,128], index: 1, kind: input, shape index: {}]   ;;  %s1278_s2 = inlined_call_operand.vmem [shape: f32[1,128], index: 2, kind: input, shape index: {}]   ;;  %s1279_s3 = inlined_call_operand.vmem [shape: bf16[128,64], index: 3, kind: input, shape index: {}]   ;;  %s1280_s4 = inlined_call_operand.vmem [shape: f32[1,64], index: 4, kind: input, shape index: {}]   ;;  %s1281_s5 = inlined_call_operand.vmem [shape: bf16[64,32], index: 5, kind: input, shape index: {}]   ;;  %s1282_s6 = inlined_call_operand.vmem [shape: f32[1,32], index: 6, kind: input, shape index: {}]   ;;  %s1283_s7 = inlined_call_operand.vmem [shape: bf16[32,128], index: 7, kind: input, shape index: {}]   ;;  %s1284_s8 = inlined_call_operand.vmem [shape: f32[1,128], index: 8, kind: input, shape index: {}]   ;;  %s1285_s9 = inlined_call_operand.hbm [shape: bf16[48,128], index: 9, kind: output, shape index: {}]  }
   0x1   :  { %16 = vsyncpa [#allocation3 + $0x1], 0  ;;  %s1094_s30 = smov 0   ;;  %s1096_s10 = smov 0  }
   0x2   :  { %s1098_s11 = smov 0   ;;  %s1100_s12 = smov 0  }
   0x3 LB: > { %s1115_s13 = sadd.s32 4294967295, %s1037_s12   ;;  %s788_s14 = sadd.s32 4294967294, %s1037_s12   ;;  %s1037_s12 = sphi %s1100_s12, %s1291_s12   ;;  %s1033_s11 = sphi %s1098_s11, %s1290_s11   ;;  %s1029_s10 = sphi %s1096_s10, %s1289_s10   ;;  %s1025_s30 = sphi %s1094_s30, %s1288_s30  }
   0x4   : > { %s1119_s15 = sadd.s32 1, %s1037_s12   ;;  %s223_s16 = sadd.s32 1, %s1033_s11 }
   0x5   : > { %s220_s17 = ssub.s32 %s1037_s12, %s1119_s15  ;;  %p233_p0 = scmp.ne.s32.totalorder %s1033_s11, %s1029_s10 }
   0x6   : > { %p221_p1 = scmp.eq.s32.totalorder %s220_s17, 0  ;;  %p234_p2 = scmp.eq.s32.totalorder %s1115_s13, 2 }
   0x7   : > { %p239_p3 = scmp.ne.s32.totalorder %s1029_s10, %s1025_s30  ;;  %p240_p4 = scmp.eq.s32.totalorder %s788_s14, 2 }
   0x8   : > { %s1130_s18 = scalar_select %p221_p1, %s1033_s11, %s223_s16  }
   0x9   : > { %p1132_p5 = por %p234_p2, %p233_p0  ;;  %p1136_p6 = por %p240_p4, %p239_p3 }
   0xa   : > { %p791_p7 = scmp.ge.s32.totalorder %s1037_s12, 1  ;;  %p291_p8 = scmp.lt.s32.totalorder %s1037_s12, 4 }
   0xc   : > { %p292_p9 = pnand %p791_p7, %p291_p8 }
   0xd   : > { %v337_v0 = vld [vmem:[%s1277_s1] sm:$0xf] (!%p292_p9)  ;;  %vm354_vm0 = vcmask (!%p292_p9), 1043456   ;;  %s793_s23 = sshll.u32 (!%p292_p9), %s1115_s13, 1  ;;  %v1039_v1 = vmov (!%p292_p9), 0.0   ;;  %vm1040_vm1 = vmmov (!%p292_p9), 0  }
   0xe   : > { %295 = sbr.rel (%p292_p9) target bundleno = 1133 (0x46d), region = 56  ;;  %851 = vmatprep.subr.bf16.mxu0 (!%p292_p9), %v1039_v1  ;;  %v356_v2 = vsel (!%p292_p9), %vm354_vm0, %v337_v0, 0  ;;  %853 = vmatprep.mubr.msk.bf16.mxu0 (!%p292_p9), %vm1040_vm1, %v1039_v1  ;;  %p328_p10 = scmp.lt.s32.totalorder (!%p292_p9), %s793_s23, 5  ;;  %v941_v3 = vld [vmem:[%s1279_s3] sm:$0xff] (!%p292_p9)   ;;  %v942_v4 = vld [vmem:[%s1279_s3 + $0x8] sm:$0xff] (!%p292_p9)   ;;  %vm350_vm2 = vcmask (!%p292_p9), 64512  }
   0xf   : > { %852 = vmatpush3.bf16.msra.mxu0 (!%p292_p9), %v356_v2  ;;  %857 = vmatprep.subr.bf16.mxu1 (!%p292_p9), %v1039_v1  ;;  %v943_v6 = vld [vmem:[%s1279_s3 + $0x10] sm:$0xff] (!%p292_p9)   ;;  %v944_v7 = vld [vmem:[%s1279_s3 + $0x18] sm:$0xff] (!%p292_p9)   ;;  %v945_v8 = vld [vmem:[%s1279_s3 + $0x20] sm:$0xff] (!%p292_p9)   ;;  %vm568_vm3 = vcmask (!%p292_p9), 523264   ;;  %vm645_vm4 = vcmask (!%p292_p9), 261120   ;;  %s826_s14 = sshll.u32 (!%p292_p9), %s1115_s13, 7 }
  0x10   : > { %858 = vmatpush3.bf16.msra.mxu1 (!%p292_p9), %v941_v3  ;;  %873 = vmatprep.mubr.msk.bf16.mxu1 (!%p292_p9), %vm1040_vm1, %v1039_v1  ;;  %v946_v9 = vld [vmem:[%s1279_s3 + $0x28] sm:$0xff] (!%p292_p9)   ;;  %v947_v10 = vld [vmem:[%s1279_s3 + $0x30] sm:$0xff] (!%p292_p9)   ;;  %v948_v11 = vld [vmem:[%s1279_s3 + $0x38] sm:$0xff] (!%p292_p9)   ;;  %s1041_s25 = smov (!%p292_p9), [#allocation2]  }
  0x11   : > { %859 = vmatprep.subr.bf16.mxu1 (!%p292_p9), %v1039_v1  ;;  %877 = vmatprep.subr.bf16.mxu0 (!%p292_p9), %v1039_v1  ;;  %v795_v12 = vld [vmem:[%s1278_s2] ss:$0 sm:$0xff] (!%p292_p9)  ;;  %v950_v29 = vld [vmem:[%s1281_s5 + $0x8] sm:$0xff] (!%p292_p9)   ;;  %v951_v30 = vld [vmem:[%s1281_s5 + $0x10] sm:$0xff] (!%p292_p9)   ;;  %s979_s26 = sshll.u32 (!%p292_p9), %s1041_s25, 4  ;;  %s980_s26 = int_to_ptr.vmem [resolvable:$false] %s979_s26 }
  0x12   : > { %v949_v28 = vld [vmem:[%s1281_s5] sm:$0xff] (!%p292_p9)   ;;  %v952_v31 = vld [vmem:[%s1281_s5 + $0x18] sm:$0xff] (!%p292_p9)   ;;  %v954_v49 = vld [vmem:[%s1283_s7 + $0x8] sm:$0xff] (!%p292_p9)   ;;  %s981_s27 = scalar_lea.vmem (!%p292_p9), %s980_s26, 256 }
  0x13   : > { %v798_v32 = vld [vmem:[%s1280_s4] ss:$0 sm:$0xff] (!%p292_p9) }
  0x14   : > { %860 = vmatpush3.bf16.msra.mxu1 (!%p292_p9), %v942_v4  ;;  %v953_v48 = vld [vmem:[%s1283_s7] sm:$0xff] (!%p292_p9)  }
  0x15   : > { %s1293_s23 = smov (!%p328_p10, %s793_s23), 5  ;;  %861 = vmatprep.subr.bf16.mxu1 %v1039_v1  ;;  %v807_v50 = vld [vmem:[%s1282_s6] ss:$0 sm:$0xff] }
  0x16   : > { %s794_s28 = sshll.u32 %s1293_s23, 2  ;;  %v813_v2 = vld [vmem:[%s1284_s8] ss:$0 sm:$0xff]  ;;  %s1231_s23 = scalar_lea.hbm %s1285_s9, %s826_s14 }
  0x17   : > { %s331_s16 = scalar_lea.vmem %s1276_s0, %s794_s28  ;;  %s324_s28 = sand.u32 1, %s1029_s10  }
  0x18   : > { %v940_v5 = vld [vmem:[%s331_s16] sm:$0xff]   ;;  %862 = vmatpush3.bf16.msra.mxu1 %v943_v6  ;;  %s792_s29 = sshll.u32 %s324_s28, 3  ;;  %s1235_s24 = scalar_lea.sflag [#allocation3], %s324_s28 }
  0x19   : > { %854 = vmatmul.mubr.msk.bf16.vlgmr.msra.gmra.mrb[0].mxu0 %vm350_vm2, %v940_v5  ;;  %863 = vmatprep.subr.bf16.mxu1 %v1039_v1  ;;  %s326_s16 = scalar_lea.vmem [#allocation2], %s792_s29 }
  0x1a   : > { %885 = vmatprep.mubr.msk.bf16.mxu0 %vm1040_vm1, %v1039_v1  ;;  %878 = vmatpush3.bf16.msra.mxu0 %v949_v28  ;;  %s726_s17 = sshll.u32 %s326_s16, 4  ;;  %s1233_s17 = int_to_ptr.vmem [resolvable:$true] %s726_s17 }
  0x1b   : > { %879 = vmatprep.subr.bf16.mxu0 %v1039_v1  ;;  %s975_s13 = scalar_lea.vmem %s1233_s17, 128  ;;  %p982_p0 = scmp.lt.s32.totalorder %s1233_s17, %s980_s26 }
  0x1c   : > { %864 = vmatpush3.bf16.msra.mxu1 %v944_v7  ;;  %p976_p11 = scmp.ne.s32.totalorder %s1233_s17, %s975_s13  ;;  %p983_p1 = scmp.lt.s32.totalorder %s981_s27, %s975_s13 }
  0x1d   : > { %865 = vmatprep.subr.bf16.mxu1 %v1039_v1 }
  0x1e   : > { %880 = vmatpush3.bf16.msra.mxu0 %v950_v29  ;;  %p977_p12 = pnand %p976_p11, %p1132_p5  ;;  %p984_p2 = por %p983_p1, %p982_p0 }
  0x1f   : > { %881 = vmatprep.subr.bf16.mxu0 %v1039_v1 }
  0x20   : > { %866 = vmatpush3.bf16.msra.mxu1 %v945_v8  ;;  %p978_p13 = pneg %p977_p12 }
  0x21   : > { %867 = vmatprep.subr.bf16.mxu1 %v1039_v1 }
  0x22   : > { %882 = vmatpush3.bf16.msra.mxu0 %v951_v30  ;;  %p985_p3 = pnand %p984_p2, %p978_p13 }
  0x23   : > { %883 = vmatprep.subr.bf16.mxu0 %v1039_v1 }
  0x24   : > { %868 = vmatpush3.bf16.msra.mxu1 %v946_v9 }
  0x25   : > { %869 = vmatprep.subr.bf16.mxu1 %v1039_v1 }
  0x26   : > { %884 = vmatpush3.bf16.msra.mxu0 %v952_v31 }
  0x27   : > { %889 = vmatprep.subr.bf16.mxu0 %v1039_v1 }
  0x28   : > { %870 = vmatpush3.bf16.msra.mxu1 %v947_v10 }
  0x29   : > { %871 = vmatprep.subr.bf16.mxu1 %v1039_v1 }
  0x2c   : > { %872 = vmatpush3.bf16.msra.mxu1 %v948_v11 }
  0xec   : > { %v392_v13 = vpop.f32.mrb[0].mxu0 }
  0xed   : > { %v393_v14 = vadd.f32 %v795_v12, %v392_v13  ;;  %v855_v15 = vpop.f32.mrb[1].mxu0 }
  0xee   : > { %v395_v16 = vpop.f32.mrb[2].mxu0 }
  0xef   : > { %v399_v17 = vmul.f32 0.5, %v393_v14  ;;  %v396_v18 = vadd.f32 %v795_v12, %v395_v16  ;;  %v856_v19 = vpop.f32.mrb[3].mxu0 }
  0xf1   : > { %955 = vtanh.f32 %v399_v17  ;;  %v400_v20 = vmul.f32 0.5, %v396_v18 }
  0xf3   : > { %957 = vtanh.f32 %v400_v20 }
  0xfb   : > { %v956_v21 = vpop.eup %955 }
  0xfc   : > { %v403_v22 = vmul.f32 0.5, %v956_v21 }
  0xfd   : > { %v958_v23 = vpop.eup %957 }
  0xfe   : > { %v404_v24 = vmul.f32 0.5, %v958_v23  ;;  %v405_v25 = vadd.f32 0.5, %v403_v22 }
 0x100   : > { %v406_v26 = vadd.f32 0.5, %v404_v24 }
 0x102   : > { %v407_v27 = vpack.c.bf16 %v406_v26, %v405_v25 }
 0x104   : > { %874 = vmatmul.mubr.bf16.vlgmr.msra.gmra.mrb[0].mxu1 %v407_v27 }
 0x1d7   : > { %v513_v33 = vpop.f32.mrb[0].mxu1 }
 0x1d8   : > { %v514_v34 = vadd.f32 %v798_v32, %v513_v33  ;;  %v875_v35 = vpop.f32.mrb[1].mxu1 }
 0x1d9   : > { %v516_v36 = vpop.f32.mrb[2].mxu1 }
 0x1da   : > { %v520_v37 = vmul.f32 0.5, %v514_v34  ;;  %v517_v38 = vadd.f32 %v798_v32, %v516_v36  ;;  %v876_v39 = vpop.f32.mrb[3].mxu1 }
 0x1dc   : > { %959 = vtanh.f32 %v520_v37  ;;  %v521_v40 = vmul.f32 0.5, %v517_v38 }
 0x1de   : > { %961 = vtanh.f32 %v521_v40 }
 0x1e6   : > { %v960_v41 = vpop.eup %959 }
 0x1e7   : > { %v524_v42 = vmul.f32 0.5, %v960_v41 }
 0x1e8   : > { %v962_v43 = vpop.eup %961 }
 0x1e9   : > { %v525_v44 = vmul.f32 0.5, %v962_v43  ;;  %v526_v45 = vadd.f32 0.5, %v524_v42 }
 0x1eb   : > { %v527_v46 = vadd.f32 0.5, %v525_v44 }
 0x1ed   : > { %v528_v47 = vpack.c.bf16 %v527_v46, %v526_v45 }
 0x1ef   : > { %886 = vmatmul.mubr.msk.bf16.vlgmr.msra.gmra.mrb[4].mxu0 %vm568_vm3, %v528_v47 }
 0x1f0   : > { %893 = vmatprep.mubr.msk.bf16.mxu0 %vm1040_vm1, %v1039_v1  ;;  %890 = vmatpush3.bf16.msra.mxu0 %v953_v48 }
 0x1f1   : > { %891 = vmatprep.subr.bf16.mxu0 %v1039_v1 }
 0x1f4   : > { %892 = vmatpush3.bf16.msra.mxu0 %v954_v49 }
 0x2c2   : > { %v606_v51 = vpop.f32.mrb[4].mxu0 }
 0x2c3   : > { %v607_v52 = vadd.f32 %v807_v50, %v606_v51  ;;  %v887_v53 = vpop.f32.mrb[5].mxu0 }
 0x2c4   : > { %v609_v54 = vpop.f32.mrb[6].mxu0 }
 0x2c5   : > { %v613_v55 = vmul.f32 0.5, %v607_v52  ;;  %v610_v56 = vadd.f32 %v807_v50, %v609_v54  ;;  %v888_v57 = vpop.f32.mrb[7].mxu0 }
 0x2c7   : > { %963 = vtanh.f32 %v613_v55  ;;  %v614_v58 = vmul.f32 0.5, %v610_v56 }
 0x2c9   : > { %965 = vtanh.f32 %v614_v58 }
 0x2d1   : > { %v964_v59 = vpop.eup %963 }
 0x2d2   : > { %v617_v60 = vmul.f32 0.5, %v964_v59 }
 0x2d3   : > { %v966_v61 = vpop.eup %965 }
 0x2d4   : > { %v618_v62 = vmul.f32 0.5, %v966_v61  ;;  %v619_v63 = vadd.f32 0.5, %v617_v60 }
 0x2d6   : > { %v620_v0 = vadd.f32 0.5, %v618_v62 }
 0x2d8   : > { %v621_v1 = vpack.c.bf16 %v620_v0, %v619_v63 }
 0x2da   : > { %894 = vmatmul.mubr.msk.bf16.vlgmr.msra.gmra.mrb[8].mxu0 %vm645_vm4, %v621_v1 }
 0x3ad   : > { %v683_v3 = vpop.f32.mrb[8].mxu0 }
 0x3ae   : > { %v684_v4 = vadd.f32 %v813_v2, %v683_v3  ;;  %v895_v5 = vpop.f32.mrb[9].mxu0 }
 0x3af   : > { %v686_v6 = vpop.f32.mrb[10].mxu0 }
 0x3b0   : > { %v690_v7 = vmul.f32 1.442695, %v684_v4  ;;  %v687_v8 = vadd.f32 %v813_v2, %v686_v6  ;;  %v896_v9 = vpop.f32.mrb[11].mxu0 }
 0x3b2   : > { %967 = vpow2.f32 %v690_v7  ;;  %v692_v10 = vmul.f32 1.442695, %v687_v8 }
 0x3b4   : > { %969 = vpow2.f32 %v692_v10 }
 0x3bc   : > { %v968_v11 = vpop.eup %967 }
 0x3bd   : > { %694 = vadd.xlane.f32.xlu0 %v968_v11 }
 0x3be   : > { %v970_v12 = vpop.eup %969 }
 0x3c1   : > { %696 = vadd.xlane.f32.xlu0 %v970_v12 }
 0x44a   : > { %v695_v13 = vpop.xlane.xlu0 %694 }
 0x44b   : > { %971 = vrcp.f32 %v695_v13 }
 0x44e   : > { %v697_v14 = vpop.xlane.xlu0 %696 }
 0x44f   : > { %973 = vrcp.f32 %v697_v14 }
 0x455   : > { %v972_v15 = vpop.eup %971 }
 0x456   : > { %v700_v17 = vmul.f32 %v972_v15, %v968_v11 }
 0x459   : > { %v974_v16 = vpop.eup %973 }
 0x45a   : > { %v701_v18 = vmul.f32 %v974_v16, %v970_v12 }
 0x45c   : > { %v830_v19 = vpack.c.bf16 %v701_v18, %v700_v17 }
 0x45e   : > { %831 = vst [vmem:[%s326_s16] sm:$0xff] %v830_v19  }
 0x45f   : > { %988 = shalt.err (!%p985_p3)
}
 0x460   : > { %s989_s28 = scalar_lea.hbm %s1231_s23, 128  ;;  %s993_s16 = scalar_lea.hbm %s1285_s9, 384 }
 0x461   : > { %p990_p4 = scmp.ne.s32.totalorder %s1231_s23, %s989_s28  ;;  %p994_p9 = scmp.lt.u32.totalorder %s1231_s23, %s1285_s9 }
 0x462   : > { %p995_p10 = scmp.lt.u32.totalorder %s993_s16, %s989_s28  ;;  %p997_p12 = scmp.lt.u32.totalorder %s989_s28, %s1231_s23 }
 0x463   : > { %p991_p7 = pnand %p990_p4, %p1132_p5 }
 0x464   : > { %p996_p11 = por %p995_p10, %p994_p9 }
 0x465   : > { %p992_p8 = pneg %p991_p7 }
 0x466   : > { %p998_p13 = por %p997_p12, %p996_p11 }
 0x468   : > { %p999_p0 = pnand %p998_p13, %p992_p8 }
 0x46a   : > { %1002 = shalt.err (!%p999_p0)
}
 0x46b   : > { %s1042_s13 = smov 64   ;;  %s1043_s25 = smov 4  }
 0x46c   : > { %897 = dma.vmem_to_hbm [thread:$0]  (%p1132_p5), %s1233_s17, 128, %s1231_s23, %s1235_s24, %s1042_s13, %s1042_s13, %s1043_s25  }
 0x46d PF: > { %p903_p1 = scmp.ge.s32.totalorder %s1037_s12, 2  ;;  %s741_s26 = sand.u32 1, %s1025_s30  }
 0x46e   : > { %s742_s27 = scalar_lea.sflag [#allocation3], %s741_s26 }
 0x46f   : > { %p900_p2 = pnand %p903_p1, %p1136_p6 }
 0x471   : > { %1020 = dma.done.wait (!%p900_p2), %s742_s27, 128  }
 0x472   : > { %1022 = vsyncadd (!%p900_p2), %s742_s27, 4294967168  ;;  %p19_p3 = scmp.ge.s32.totalorder %s1119_s15, 5   ;;  %s1288_s30 = smov %s1029_s10 }
 0x473   : > { %s1289_s10 = smov %s1033_s11  ;;  %s1290_s11 = smov %s1130_s18 }
 0x474   : > { %s1291_s12 = smov %s1119_s15  ;;  %21 = sbr.rel (!%p19_p3) target bundleno = 3 (0x3), region = 91 }
 0x47b   :  { %747 = vsyncpa [#allocation3], 1 }
 0x47c   :  { %749 = vsyncpa [#allocation3 + $0x1], 1 }

</bundles_post_ra>
